<compile_context>
chip_gen: v5e
topology: v5e:2x2
jax: 0.10.0
libtpu: 0.0.40
codegen_flags: <defaults>
</compile_context>

<pallas_src>
import math

import jax
import jax.numpy as jnp
from jax.experimental import pallas as pl
from jax.experimental.pallas import tpu as pltpu


# --------------------------------------------------------------------------- #
# Kernels
# --------------------------------------------------------------------------- #
def _matmul_kernel_ws(x_ref, w_ref, o_ref):
    """Weight-stationary matmul: full-K blocks, one dot per output tile.

    Grid is (j, i) with j outer: the W block index depends only on j, so the
    (K, tn) weight stripe stays resident in VMEM across all row tiles i and is
    DMA'd from HBM exactly once per output-column stripe.
    """
    o_ref[...] = jnp.dot(
        x_ref[...], w_ref[...], preferred_element_type=jnp.float32
    ).astype(o_ref.dtype)


def _matmul_kernel_f32_out(x_ref, w_ref, o_ref):
    """K-tiled matmul accumulating directly into the f32 output block."""
    @pl.when(pl.program_id(2) == 0)
    def _():
        o_ref[...] = jnp.zeros_like(o_ref)

    o_ref[...] += jnp.dot(
        x_ref[...], w_ref[...], preferred_element_type=jnp.float32
    )


def _matmul_kernel_acc_scratch(x_ref, w_ref, o_ref, acc_ref):
    """K-tiled matmul with an f32 VMEM accumulator (non-f32 outputs)."""
    @pl.when(pl.program_id(2) == 0)
    def _():
        acc_ref[...] = jnp.zeros_like(acc_ref)

    acc_ref[...] += jnp.dot(
        x_ref[...], w_ref[...], preferred_element_type=jnp.float32
    )

    @pl.when(pl.program_id(2) == pl.num_programs(2) - 1)
    def _():
        o_ref[...] = acc_ref[...].astype(o_ref.dtype)


# --------------------------------------------------------------------------- #
# Hardware / tiling helpers
# --------------------------------------------------------------------------- #
def _round_up(x: int, m: int) -> int:
    return ((x + m - 1) // m) * m


def _tpu_vmem_capacity() -> int:
    try:
        return int(pltpu.get_tpu_info().vmem_capacity_bytes)
    except Exception:
        return 128 * 1024 * 1024


def _is_v5e() -> bool:
    try:
        kind = jax.devices()[0].device_kind.lower()
    except Exception:
        return False
    return ("v5 lite" in kind) or ("v5e" in kind) or ("v5litepod" in kind)


def _vmem_limit_bytes() -> int:
    """Scoped-VMEM limit: ~3/4 of physical, capped at 96 MiB.
    (v5e/v6e: 128 MiB -> 96 MiB; v7x: 64 MiB -> 48 MiB)."""
    cap = _tpu_vmem_capacity()
    return min((cap * 3) // 4, 96 * 1024 * 1024)


def _sublane_tile(dim: int, candidates) -> tuple[int, int]:
    """Tile for a second-minor (sublane-mapped) dim -> (tile, padded_dim).

    Preference order: (a) largest candidate that divides `dim` (no padding),
    (b) a single full-extent block (exempt from the 8-row rule, no padding),
    (c) largest candidate with <=12.5% padding waste.
    """
    for t in candidates:
        if t <= dim and dim % t == 0:
            return t, dim
    if dim <= candidates[0]:
        return dim, dim
    for t in candidates:
        if (_round_up(dim, t) - dim) * 8 <= dim:
            return t, _round_up(dim, t)
    t = candidates[-1]
    return t, _round_up(dim, t)


def _lane_tile(dim: int, candidates) -> tuple[int, int]:
    """Tile for a minor (lane-mapped) dim -> (tile, padded_dim).

    Uses a 128-multiple divisor when possible, otherwise a full-extent block
    (exempt from the 128-lane rule).  Padding only for very large, unaligned
    dims (rare for real layer widths).
    """
    if dim % 128 == 0:
        for t in candidates:
            if t <= dim and dim % t == 0:
                return t, dim
        return 128, dim
    if dim <= 2048:
        return dim, dim
    for t in candidates:
        if (_round_up(dim, t) - dim) * 8 <= dim:
            return t, _round_up(dim, t)
    t = candidates[-1]
    return t, _round_up(dim, t)


# --------------------------------------------------------------------------- #
# Forward
# --------------------------------------------------------------------------- #
def linear_forward(x: jax.Array, weights: jax.Array, *,
                   force_k_tiling: bool = False) -> jax.Array:
    """y = x @ weights (no bias), matching FunctionalLinear.forward.

    x:       (..., in_features)
    weights: (in_features, out_features)
    returns: (..., out_features)
    """
    *lead, in_features = x.shape
    K, N = weights.shape
    assert K == in_features, f"weight/in_features mismatch: {K} vs {in_features}"

    M = int(math.prod(lead)) if lead else 1
    out_dtype = jnp.result_type(x.dtype, weights.dtype)
    x_item = jnp.dtype(x.dtype).itemsize
    w_item = jnp.dtype(weights.dtype).itemsize
    o_item = jnp.dtype(out_dtype).itemsize

    x2d = x.reshape(M, K)

    vmem_limit = _vmem_limit_bytes()
    ws_budget = (vmem_limit * 3) // 5          # ~0.6 * scoped limit (gen-aware)
    v5e = _is_v5e()

    # v5e: 4x128x128 MXU, low ridge -> 512-wide, 128-aligned tiles.
    # v6e/v7x: 2x256x256 MXU, ~620-680 FLOP/B ridge -> up to 1024-wide,
    # 256-multiple tiles (smaller tk so tiles still fit v7x's 48 MiB).
    if v5e:
        tm_cands = (512, 256, 128)
        tn_cands = (512, 384, 256, 128)
        tk_cands = (512, 256, 128)
    else:
        tm_cands = (1024, 512, 256, 128)
        tn_cands = (1024, 512, 256, 128)
        tk_cands = (512, 256, 128)

    # dtype-aware sublane packing (f32: 8 rows/vreg, bf16: 16, int8/fp8: 32)
    m_align = 8 * max(1, 4 // max(1, x_item))

    tm, Mp = _sublane_tile(M, tm_cands)
    tn, Np = _lane_tile(N, tn_cands)

    # ----------------------------------------------------------------- #
    # Path selection
    # ----------------------------------------------------------------- #
    # Weight-stationary: keep a double-buffered full-K weight stripe resident
    # in VMEM across all row tiles.  Full-extent K blocks are exempt from the
    # (8,128) rule, so neither x nor W is ever padded along K.
    ws_bytes = (2 * tm * K * x_item           # double-buffered x stripe
                + 2 * K * tn * w_item         # double-buffered W stripe
                + 2 * tm * tn * o_item)       # double-buffered out tile
    use_ws = (not force_k_tiling) and ws_bytes <= ws_budget

    if use_ws:
        # Never emit a 1x1 grid: both v7x TensorCores / megacore halves should
        # get work even for small-M (decode) shapes.
        if (Np // tn) * (Mp // tm) == 1:
            if N % 256 == 0 and N >= 256:
                tn = N // 2                       # still a 128-multiple
            elif M == Mp and M >= 2 * m_align and M % (2 * m_align) == 0:
                tm = M // 2

        grid = (Np // tn, Mp // tm)           # j outer, i inner -> W resident
        in_specs = [
            pl.BlockSpec((tm, K), lambda j, i: (i, 0)),
            pl.BlockSpec((K, tn), lambda j, i: (0, j)),
        ]
        out_specs = pl.BlockSpec((tm, tn), lambda j, i: (i, j))
        kernel = _matmul_kernel_ws
        scratch_shapes = ()
        dim_sem = ("parallel", "parallel")
        Kp = K                                 # never pad K (or W) on this path
        # TODO(synk): optionally pipeline_mode=pl.Buffered(3) on the W spec to
        # deepen lookahead across j boundaries when VMEM headroom allows.
    else:
        tk, Kp = _lane_tile(K, tk_cands)

        # Keep the double-buffered K-tiled working set inside the scoped limit
        # (mainly matters on v7x's 48 MiB): shrink tm, then tn, then tk.
        def _kt_bytes(tm_, tn_, tk_):
            b = (2 * tm_ * tk_ * x_item + 2 * tk_ * tn_ * w_item
                 + 2 * tm_ * tn_ * o_item)
            if out_dtype != jnp.float32:
                b += tm_ * tn_ * 4             # f32 accumulator scratch
            return b

        kt_budget = (vmem_limit * 7) // 10
        while _kt_bytes(tm, tn, tk) > kt_budget:
            if tm > 256 and tm % (2 * m_align) == 0 and Mp % (tm // 2) == 0:
                tm //= 2
            elif tn > 256 and tn % 256 == 0 and Np % (tn // 2) == 0:
                tn //= 2
            elif tk > 128 and tk % 256 == 0 and Kp % (tk // 2) == 0:
                tk //= 2
            else:
                break

        grid = (Mp // tm, Np // tn, Kp // tk)
        in_specs = [
            pl.BlockSpec((tm, tk), lambda i, j, k: (i, k)),
            pl.BlockSpec((tk, tn), lambda i, j, k: (k, j)),
        ]
        out_specs = pl.BlockSpec((tm, tn), lambda i, j, k: (i, j))
        if out_dtype == jnp.float32:
            # Accumulate straight into the VMEM-resident f32 output block.
            kernel = _matmul_kernel_f32_out
            scratch_shapes = ()
        else:
            kernel = _matmul_kernel_acc_scratch
            scratch_shapes = (pltpu.VMEM((tm, tn), jnp.float32),)
        dim_sem = ("parallel", "parallel", "arbitrary")

    # ---- pad only what is strictly necessary (never K or W in the WS path) --
    if (Mp, Kp) != (M, K):
        x2d = jnp.pad(x2d, ((0, Mp - M), (0, Kp - K)))
    w = weights
    if (Kp, Np) != (K, N):
        # TODO(synk): if a layer repeatedly hits this (very large, non-128
        # aligned K/N on the K-tiled path), cache the padded W on the module.
        w = jnp.pad(w, ((0, Kp - K), (0, Np - N)))

    cost = pl.CostEstimate(
        flops=2 * M * N * K,
        bytes_accessed=M * K * x_item + K * N * w_item + M * N * o_item,
        transcendentals=0,
    )

    out_padded = pl.pallas_call(
        kernel,
        out_shape=jax.ShapeDtypeStruct((Mp, Np), out_dtype),
        grid_spec=pltpu.PrefetchScalarGridSpec(
            num_scalar_prefetch=0,
            grid=grid,
            in_specs=in_specs,
            out_specs=out_specs,
            scratch_shapes=scratch_shapes,
        ),
        compiler_params=pltpu.CompilerParams(
            dimension_semantics=dim_sem,
            vmem_limit_bytes=vmem_limit,
        ),
        cost_estimate=cost,
    )(x2d, w)

    out = out_padded
    if (Mp, Np) != (M, N):
        out = out_padded[:M, :N]
    return out.reshape(*lead, N)


# --------------------------------------------------------------------------- #
# Module
# --------------------------------------------------------------------------- #
class Linear:
    """JAX/Pallas port of the custom Linear module (no bias)."""

    def __init__(self, in_features: int, out_features: int,
                 init_method: str = "xavier", key=None):
        self.in_features = in_features
        self.out_features = out_features
        if key is None:
            key = jax.random.PRNGKey(0)

        valid_methods = ["xavier", "normal", "kaiming-he"]
        assert init_method in valid_methods, (
            f"Invalid initialization method. Must be one of {valid_methods}"
        )
        if init_method == "xavier":
            # xavier_normal_: std = gain * sqrt(2 / (fan_in + fan_out)), gain=1
            std = math.sqrt(2.0 / (in_features + out_features))
        elif init_method == "normal":
            std = 1.0
        else:
            # kaiming_normal_: std = sqrt(2 / fan_in)
            std = math.sqrt(2.0 / in_features)

        self.weights = std * jax.random.normal(
            key, (in_features, out_features), dtype=jnp.float32
        )

    def __call__(self, x: jax.Array) -> jax.Array:
        return linear_forward(x, self.weights)

    # TODO(synk): backward (FunctionalLinear.backward) not ported; use jax.grad
    # or a custom VJP if gradients are needed.


if __name__ == "__main__":
    key = jax.random.PRNGKey(0)
    k_x, k_w = jax.random.split(key)

    batch, seq, in_features, out_features = 2, 8, 32, 64
    x = jax.random.normal(k_x, (batch, seq, in_features), dtype=jnp.float32)

    layer = Linear(in_features, out_features, init_method="xavier", key=k_w)

    y_ref = jnp.einsum("bsk,kn->bsn", x, layer.weights,
                       precision=jax.lax.Precision.HIGHEST)

    # Default (weight-stationary) path.
    y = jax.block_until_ready(layer(x))
    assert y.shape == (batch, seq, out_features)
    assert jnp.allclose(y, y_ref, atol=1e-4, rtol=1e-4)

    # Also exercise the K-tiled reduction path (used for very large layers).
    y_kt = jax.block_until_ready(
        linear_forward(x, layer.weights, force_k_tiling=True))
    assert y_kt.shape == (batch, seq, out_features)
    assert jnp.allclose(y_kt, y_ref, atol=1e-4, rtol=1e-4)

    print("KERNEL_OK")
</pallas_src>

<mosaic_0001>
module attributes {stable_mosaic.version = 11 : i64} {
  func.func @_matmul_kernel_ws(%arg0: i32, %arg1: i32, %arg2: memref<8x32xf32, #tpu.memory_space<vmem>>, %arg3: memref<32x64xf32, #tpu.memory_space<vmem>>, %arg4: memref<8x64xf32, #tpu.memory_space<vmem>>) attributes {dimension_semantics = [#tpu.dimension_semantics<parallel>, #tpu.dimension_semantics<parallel>], iteration_bounds = array<i64: 1, 2>, scalar_prefetch = 0 : i64, scratch_operands = 0 : i64, tpu.core_type = #tpu.core_type<tc>, window_params = [{transform_indices = @transform_0, window_bounds = array<i64: 8, 32>}, {transform_indices = @transform_1, window_bounds = array<i64: 32, 64>}, {transform_indices = @transform_2, window_bounds = array<i64: 8, 64>}]} {
    %c0 = arith.constant 0 : index
    %c0_0 = arith.constant 0 : index
    %0 = vector.load %arg2[%c0, %c0_0] : memref<8x32xf32, #tpu.memory_space<vmem>>, vector<8x32xf32>
    %c0_1 = arith.constant 0 : index
    %c0_2 = arith.constant 0 : index
    %1 = vector.load %arg3[%c0_1, %c0_2] : memref<32x64xf32, #tpu.memory_space<vmem>>, vector<32x64xf32>
    %cst = arith.constant dense<0.000000e+00> : vector<8x64xf32>
    %2 = tpu.matmul %0, %1, %cst {dimension_numbers = #tpu.dot_dimension_numbers<[1], [0], [0], [1], [0, 0, 1, 1], [], []>} : vector<8x32xf32>, vector<32x64xf32>, vector<8x64xf32> -> vector<8x64xf32>
    %c0_3 = arith.constant 0 : index
    %c0_4 = arith.constant 0 : index
    %3 = vector.load %arg4[%c0_3, %c0_4] : memref<8x64xf32, #tpu.memory_space<vmem>>, vector<8x64xf32>
    tpu.vector_store %arg4[%c0_3, %c0_4], %2 {strides = array<i32>} : memref<8x64xf32, #tpu.memory_space<vmem>>, vector<8x64xf32>,
    return
  }
  func.func @transform_0(%arg0: i32, %arg1: i32) -> (i32, i32) {
    %c0_i32 = arith.constant 0 : i32
    %c0_i32_0 = arith.constant 0 : i32
    return %arg1, %c0_i32 : i32, i32
  }
  func.func @transform_1(%arg0: i32, %arg1: i32) -> (i32, i32) {
    %c0_i32 = arith.constant 0 : i32
    %c0_i32_0 = arith.constant 0 : i32
    return %c0_i32, %arg0 : i32, i32
  }
  func.func @transform_2(%arg0: i32, %arg1: i32) -> (i32, i32) {
    %c0_i32 = arith.constant 0 : i32
    return %arg1, %arg0 : i32, i32
  }
}

</mosaic_0001>

<bundles_post_ra>
// kernel: tpu_custom_call.1
= control target key start
LH: loop header
LB: loop body
LE: loop exit
PB: predicated region body
PF: predicated region fallthrough
CT: control target
= control target key end

     0   :  { %7 = vsyncpa [#allocation3], 0  ;;  %s738_s0 = inlined_call_operand.hbm [shape: f32[16,32], index: 0, kind: input, shape index: {}]   ;;  %s739_s1 = inlined_call_operand.hbm [shape: f32[32,64], index: 1, kind: input, shape index: {}]   ;;  %s740_s2 = inlined_call_operand.hbm [shape: f32[16,64], index: 2, kind: output, shape index: {}]  }
   0x1   :  { %9 = vsyncpa [#allocation3 + $0x1], 0 }
   0x2   :  { %10 = vsyncpa [#allocation6], 0 }
   0x3   :  { %11 = vsyncpa [#allocation4], 0 }
   0x4   :  { %13 = vsyncpa [#allocation4 + $0x1], 0  ;;  %s595_s9 = smov 0   ;;  %s597_s10 = smov 0  }
   0x5   :  { %s599_s11 = smov 0   ;;  %s601_s12 = smov 0  }
   0x6   :  { %s603_s13 = smov 0   ;;  %s605_s14 = smov 0  }
   0x7 LB: > { %s338_s15 = sadd.s32 4294967295, %s575_s14   ;;  %p340_p0 = scmp.ge.s32.totalorder %s575_s14, 1  ;;  %s575_s14 = sphi %s605_s14, %s19_s14   ;;  %s571_s13 = sphi %s603_s13, %s751_s13   ;;  %s567_s12 = sphi %s601_s12, %s750_s12   ;;  %s563_s11 = sphi %s599_s11, %s749_s11   ;;  %s559_s10 = sphi %s597_s10, %s748_s10   ;;  %s555_s9 = sphi %s595_s9, %s747_s9  }
   0x8   : > { %p627_p1 = scmp.eq.s32.totalorder %s338_s15, 0  ;;  %p116_p2 = scmp.lt.s32.totalorder %s575_s14, 3 }
   0x9   : > { %s129_s19 = sshll.u32 %s739_s1, 4  ;;  %s577_s21 = smov [#allocation5]   ;;  %s130_s19 = int_to_ptr.hbm [resolvable:$true] %s129_s19 }
   0xa   : > { %p635_p3 = pnand %p340_p0, %p116_p2  ;;  %s131_s22 = sshll.u32 %s577_s21, 4  ;;  %s132_s22 = int_to_ptr.vmem [resolvable:$true] %s131_s22 }
   0xb   : > { %p342_p6 = scmp.ge.s32.totalorder %s575_s14, 2  ;;  %s578_s23 = smov 128  }
   0xc   : > { %p362_p4 = pneg %p635_p3  ;;  %s579_s24 = smov 8  }
   0xd   : > { %s339_s25 = sadd.s32 4294967294, %s575_s14   ;;  %s28_s26 = sadd.s32 1, %s571_s13 }
   0xe   : > { %p363_p5 = pnand %p362_p4, %p627_p1  ;;  %s38_s27 = sadd.s32 1, %s563_s11 }
   0xf   : > { %p29_p7 = scmp.ge.s32.totalorder %s28_s26, 2  ;;  %p45_p8 = scmp.ne.s32.totalorder %s563_s11, %s559_s10 }
  0x10   : > { %365 = dma.hbm_to_vmem [thread:$0]  (!%p363_p5), %s130_s19, 512, %s132_s22, [#allocation6], %s578_s23, %s578_s23, %s579_s24  }
  0x11   : > { %p46_p9 = scmp.eq.s32.totalorder %s575_s14, 0  ;;  %p51_p10 = scmp.ne.s32.totalorder %s559_s10, %s555_s9 }
  0x12   : > { %s753_s26 = smov (%p29_p7, %s28_s26), 0  ;;  %p103_p13 = scmp.eq.s32.totalorder %s338_s15, 1 }
  0x13   : > { %p654_p11 = por %p46_p9, %p45_p8  ;;  %p660_p12 = por %p627_p1, %p51_p10 }
  0x14   : > { %s35_s30 = ssub.s32 %s571_s13, %s753_s26  ;;  %p109_p2 = scmp.eq.s32.totalorder %s339_s25, 1 }
  0x15   : > { %p36_p0 = scmp.eq.s32.totalorder %s35_s30, 0  ;;  %p666_p4 = por %p103_p13, %p45_p8 }
  0x16   : > { %p375_p5 = scmp.lt.s32.totalorder %s575_s14, 2  ;;  %p674_p7 = por %p109_p2, %p51_p10 }
  0x17   : > { %s672_s4 = scalar_select %p36_p0, %s563_s11, %s38_s27  }
  0x18   : > { %s145_s6 = sand.u32 1, %s563_s11   ;;  %s344_s8 = sshll.u32 %s571_s13, 3 }
  0x19   : > { %s343_s7 = sshll.u32 %s145_s6, 3  ;;  %s153_s15 = scalar_lea.hbm %s738_s0, %s344_s8 }
  0x1a   : > { %s149_s19 = scalar_lea.vmem [#allocation2], %s343_s7  ;;  %s155_s22 = sshll.u32 %s153_s15, 4  ;;  %s156_s22 = int_to_ptr.hbm [resolvable:$true] %s155_s22 }
  0x1b   : > { %s157_s21 = sshll.u32 %s149_s19, 4  ;;  %p367_p8 = pnand %p375_p5, %p654_p11  ;;  %s158_s21 = int_to_ptr.vmem [resolvable:$true] %s157_s21 }
  0x1c   : > { %s146_s23 = scalar_lea.sflag [#allocation3], %s145_s6  ;;  %166 = sbr.rel (%p635_p3) target bundleno = 173 (0xad), region = 28 }
  0x1d   : > { %369 = dma.hbm_to_vmem [thread:$0]  (!%p367_p8), %s156_s22, 128, %s158_s21, %s146_s23  }
  0x1e   : > { %s688_s24 = sand.u32 (!%p635_p3), 1, %s559_s10  }
  0x1f   : > { %s346_s25 = sshll.u32 (!%p635_p3), %s688_s24, 3  ;;  %s169_s27 = scalar_lea.sflag (!%p635_p3), [#allocation3], %s688_s24 }
  0x20   : > { %s172_s30 = scalar_lea.vmem (!%p635_p3), [#allocation2], %s346_s25 }
  0x21   : > { %542 = dma.done.wait (%p660_p12), %s169_s27, 128  }
  0x22   : > { %544 = vsyncadd (%p660_p12), %s169_s27, 4294967168 }
  0x23   : > { %546 = dma.done.wait (%p627_p1), [#allocation6], 512  }
  0x24   : > { %548 = vsyncadd (%p627_p1), [#allocation6], 4294966784  ;;  %v203_v0 = vld [vmem:[#allocation5 + $0x18] sm:$0xff]  ;;  %v202_v1 = vld [vmem:[#allocation5 + $0x10] sm:$0xff]  ;;  %vm204_vm0 = vcmask 261120   ;;  %s351_s20 = sshll.u32 %s567_s12, 3 }
  0x25   : > { %220 = vmatpush.msra.mxu0 %v203_v0  ;;  %v201_v2 = vld [vmem:[#allocation5 + $0x8] sm:$0xff]  ;;  %v200_v3 = vld [vmem:[#allocation5] sm:$0xff]  ;;  %v199_v4 = vld [vmem:[%s172_s30] sm:$0xff]  ;;  %s242_s16 = scalar_lea.hbm %s740_s2, %s351_s20  ;;  %s198_s6 = scalar_lea.vmem [#allocation7], %s346_s25  ;;  %vm228_vm1 = vcmask 523264  }
  0x26   : > { %s244_s7 = sshll.u32 %s198_s6, 4  ;;  %s246_s8 = sshll.u32 %s242_s16, 4  ;;  %s245_s7 = int_to_ptr.vmem [resolvable:$true] %s244_s7  ;;  %s247_s8 = int_to_ptr.hbm [resolvable:$true] %s246_s8 }
  0x27   : > { %221 = vmatpush.msra.mxu0 %v202_v1  ;;  %s231_s17 = scalar_lea.sflag [#allocation4], %s688_s24  ;;  %s503_s18 = sshra.s32 %s247_s8, 4  ;;  %s504_s18 = int_to_ptr.hbm [resolvable:$true] %s503_s18 }
  0x28   : > { %s505_s15 = scalar_lea.hbm %s504_s18, 8  ;;  %s509_s21 = scalar_lea.hbm %s740_s2, 16 }
  0x29   : > { %222 = vmatpush.msra.mxu0 %v201_v2  ;;  %p506_p1 = scmp.ne.s32.totalorder %s504_s18, %s505_s15  ;;  %p510_p10 = scmp.lt.s32.totalorder %s504_s18, %s740_s2 }
  0x2a   : > { %p511_p11 = scmp.lt.s32.totalorder %s509_s21, %s505_s15 }
  0x2b   : > { %223 = vmatpush.msra.mxu0 %v200_v3  ;;  %p507_p3 = pnand %p506_p1, %p666_p4 }
  0x2c   : > { %349 = vmatmul.msk.f32.vlgmr.msra.gmra.mxu0 %vm204_vm0, %v199_v4  ;;  %p512_p12 = por %p511_p11, %p510_p10 }
  0x2d   : > { %p508_p9 = pneg %p507_p3 }
  0x2f   : > { %p513_p13 = pnand %p512_p12, %p508_p9 }
  0xa9   : > { %v225_v5 = vpop.f32.mrf.mxu0 }
  0xaa   : > { %229 = vst.msk [vmem:[%s198_s6] sm:$0xff] %vm228_vm1, %v225_v5 }
  0xab   : > { %516 = shalt.err (!%p513_p13)
}
  0xac   : > { %360 = dma.vmem_to_hbm [thread:$0]  (%p666_p4), %s245_s7, 128, %s247_s8, %s231_s17  }
  0xad PF: > { %s258_s24 = sand.u32 1, %s555_s9   ;;  %p371_p0 = pnand %p342_p6, %p674_p7 }
  0xae   : > { %s259_s25 = scalar_lea.sflag [#allocation4], %s258_s24 }
  0xaf   : > { %p372_p2 = pneg %p371_p0 }
  0xb1   : > { %550 = dma.done.wait (%p372_p2), %s259_s25, 128  }
  0xb2   : > { %552 = vsyncadd (%p372_p2), %s259_s25, 4294967168  ;;  %s19_s14 = sadd.s32 1, %s575_s14   ;;  %s747_s9 = smov %s559_s10 }
  0xb3   : > { %p16_p5 = scmp.ge.s32.totalorder %s19_s14, 4   ;;  %s748_s10 = smov %s563_s11 }
  0xb4   : > { %s749_s11 = smov %s672_s4  ;;  %s750_s12 = smov %s571_s13 }
  0xb5   : > { %s751_s13 = smov %s753_s26  ;;  %18 = sbr.rel (!%p16_p5) target bundleno = 7 (0x7), region = 78 }
  0xba   :  { %265 = vsyncpa [#allocation3], 1 }
  0xbb   :  { %267 = vsyncpa [#allocation3 + $0x1], 1 }
  0xbc   :  { %268 = vsyncpa [#allocation6], 1 }
  0xbd   :  { %269 = vsyncpa [#allocation4], 1 }
  0xbe   :  { %271 = vsyncpa [#allocation4 + $0x1], 1 }

</bundles_post_ra>
